<compile_context>
chip_gen: v6e
topology: v6e:2x2x1
jax: 0.10.0
libtpu: 0.0.40
codegen_flags: <defaults>
</compile_context>

<pallas_src>
import functools

import jax
import jax.numpy as jnp
from jax.experimental import pallas as pl
from jax.experimental.pallas import tpu as pltpu


# --------------------------------------------------------------------------- #
# Hardware-aware sizing helpers
# --------------------------------------------------------------------------- #
def _vmem_limit_bytes():
    """Scoped-VMEM limit to request, derived from physical VMEM capacity."""
    cap = 64 * 1024 * 1024
    try:
        cap = int(pltpu.get_tpu_info().vmem_capacity_bytes)
    except Exception:
        pass
    if cap >= 100 * 1024 * 1024:      # v5e / v6e class parts (128 MiB physical)
        return 64 * 1024 * 1024
    return 32 * 1024 * 1024           # v7x class (64 MiB physical): scoped default


def _stage1_hw_tile(hw, c, itemsize, block_target):
    """128-multiple lane tile for the streaming pool pass.

    C/dtype aware: a double-buffered input stream stays near 2*block_target;
    capped at 8192 lanes to bound the per-step 128-lane strip unroll."""
    t = block_target // max(c * itemsize, 1)
    t = max(min(t, 8192, hw), 512)
    t = max((t // 128) * 128, 128)
    hw_cap = max((hw // 128) * 128, 128)
    return min(t, hw_cap)


def _stage2_tiles(nc, hw, itemsize, block_target):
    """(row_tile, hw_tile) for the flattened (N*C, HW) scale pass."""
    target_elems = max(block_target // itemsize, 8 * 128)
    if hw <= 128:
        hw_tile = hw                                   # full dim (always legal)
    else:
        hw_cap = (hw // 128) * 128
        hw_tile = min(hw_cap, max(((target_elems // 8) // 128) * 128, 128))
    if nc <= 8:
        r_tile = nc                                    # full dim (always legal)
    else:
        r_tile = (min(target_elems // max(hw_tile, 1), nc) // 8) * 8
        r_tile = max(r_tile, 8)
    return r_tile, hw_tile


# --------------------------------------------------------------------------- #
# Kernels
# --------------------------------------------------------------------------- #
def _excite(pooled_f32, w1_ref, w2t_ref):
    """Gate = sigmoid(relu(pooled @ W1) @ W2) computed on VPU/XLU (no MXU)."""
    w1 = w1_ref[...].astype(jnp.float32)               # (C, C_r)
    w2t = w2t_ref[...].astype(jnp.float32)              # (C, C_r)
    h1 = jnp.maximum(jnp.sum(pooled_f32 * w1, axis=0, keepdims=True), 0.0)  # (1, C_r)
    z = jnp.sum(w2t * h1, axis=1, keepdims=True)                            # (C, 1)
    return jax.nn.sigmoid(z)


def _fused_kernel(x_ref, w1_ref, w2t_ref, o_ref, *, inv_hw):
    """One resident (C, HW) slab per batch element: pool + gate + rescale."""
    x = x_ref[...]                                       # (C, HW)
    xf = x.astype(jnp.float32)
    pooled = jnp.sum(xf, axis=1, keepdims=True) * inv_hw  # (C, 1)
    gate = _excite(pooled, w1_ref, w2t_ref).astype(x.dtype)
    o_ref[...] = x * gate


def _pool_gate_kernel(x_ref, w1_ref, w2t_ref, s_ref, acc_ref, *,
                      inv_hw, hw_total, hw_tile):
    """Streaming global-avg-pool + gate.  acc_ref: (C, 128) f32 VALU accumulator;
    s_ref: (C, 1) gate in x.dtype, written once per batch element."""
    h = pl.program_id(1)

    @pl.when(h == 0)
    def _init():
        acc_ref[...] = jnp.zeros_like(acc_ref)

    xf = x_ref[...].astype(jnp.float32)                  # (C, hw_tile)
    if hw_total % hw_tile != 0:
        # Tail block: out-of-bounds lanes hold unspecified data -> mask them.
        lane = jax.lax.broadcasted_iota(jnp.int32, xf.shape, 1)
        xf = jnp.where(lane < (hw_total - h * hw_tile), xf, 0.0)

    # Fold the tile into 128-lane strips with plain VPU adds; one RMW per step.
    part = xf[:, 0:128]
    for j in range(1, hw_tile // 128):
        part = part + xf[:, j * 128:(j + 1) * 128]
    acc_ref[...] += part

    @pl.when(h == pl.num_programs(1) - 1)
    def _finalize():
        pooled = jnp.sum(acc_ref[...], axis=1, keepdims=True) * inv_hw  # (C, 1)
        s_ref[...] = _excite(pooled, w1_ref, w2t_ref).astype(s_ref.dtype)


def _scale_kernel(x_ref, s_ref, o_ref):
    # x_ref/o_ref: (r_tile, hw_tile); s_ref: (r_tile, 1), already in x.dtype.
    o_ref[...] = x_ref[...] * s_ref[...]


# --------------------------------------------------------------------------- #
# Wrapper
# --------------------------------------------------------------------------- #
def se_layer(x, w1, w2t, *, force_two_stage=False):
    """x: (N, C, H, W); w1: (C, C_r); w2t: (C, C_r). Returns (N, C, H, W)."""
    N, C, H, W = x.shape
    HW = H * W
    C_r = w1.shape[1]
    itemsize = x.dtype.itemsize
    x_flat = x.reshape(N, C, HW)

    vmem_limit = _vmem_limit_bytes()
    block_target = vmem_limit // 8

    slab_bytes = C * HW * itemsize
    extra_f32 = 0 if x.dtype == jnp.float32 else C * HW * 4
    w_bytes = (w1.size * w1.dtype.itemsize + w2t.size * w2t.dtype.itemsize
               + 2 * C * C_r * 4)
    # in x2 + out x2 double-buffered slabs + f32 temp + weights + 4 MiB margin.
    fused_fits = (4 * slab_bytes + extra_f32 + w_bytes + (4 << 20)) <= vmem_limit
    use_fused = (not force_two_stage) and (fused_fits or HW < 256)

    if use_fused:
        # ---- Fused single pass: pool + gate + rescale, 1 read + 1 write of x ----
        out_flat = pl.pallas_call(
            functools.partial(_fused_kernel, inv_hw=1.0 / float(HW)),
            out_shape=jax.ShapeDtypeStruct((N, C, HW), x.dtype),
            grid_spec=pltpu.PrefetchScalarGridSpec(
                num_scalar_prefetch=0,
                grid=(N,),
                in_specs=[
                    pl.BlockSpec((pl.Squeezed(), C, HW), lambda n: (n, 0, 0)),
                    pl.BlockSpec((C, C_r), lambda n: (0, 0)),
                    pl.BlockSpec((C, C_r), lambda n: (0, 0)),
                ],
                out_specs=pl.BlockSpec((pl.Squeezed(), C, HW),
                                       lambda n: (n, 0, 0)),
            ),
            compiler_params=pltpu.CompilerParams(
                dimension_semantics=("parallel",),
                vmem_limit_bytes=vmem_limit),
            cost_estimate=pl.CostEstimate(
                flops=int(2 * N * C * HW + 4 * N * C * C_r),
                transcendentals=int(N * C),
                bytes_accessed=int(2 * N * C * HW * itemsize + w_bytes)),
        )(x_flat, w1, w2t)
        return out_flat.reshape(N, C, H, W)

    # ---- Streaming two-stage fallback (slab too big for VMEM) ----
    # Stage 1: global average pool + excitation gate -> s (N, C, 1) in x.dtype.
    hw1_tile = _stage1_hw_tile(HW, C, itemsize, block_target)
    s = pl.pallas_call(
        functools.partial(_pool_gate_kernel, inv_hw=1.0 / float(HW),
                          hw_total=HW, hw_tile=hw1_tile),
        out_shape=jax.ShapeDtypeStruct((N, C, 1), x.dtype),
        grid_spec=pltpu.PrefetchScalarGridSpec(
            num_scalar_prefetch=0,
            grid=(N, pl.cdiv(HW, hw1_tile)),
            in_specs=[
                pl.BlockSpec((pl.Squeezed(), C, hw1_tile),
                             lambda n, h: (n, 0, h)),
                pl.BlockSpec((C, C_r), lambda n, h: (0, 0)),
                pl.BlockSpec((C, C_r), lambda n, h: (0, 0)),
            ],
            out_specs=pl.BlockSpec((pl.Squeezed(), C, 1), lambda n, h: (n, 0, 0)),
            scratch_shapes=[pltpu.VMEM((C, 128), jnp.float32)],
        ),
        compiler_params=pltpu.CompilerParams(
            dimension_semantics=("parallel", "arbitrary"),
            vmem_limit_bytes=vmem_limit),
        cost_estimate=pl.CostEstimate(
            flops=int(N * C * HW + 4 * N * C * C_r),
            transcendentals=int(N * C),
            bytes_accessed=int(N * C * HW * itemsize + N * C * itemsize + w_bytes)),
    )(x_flat, w1, w2t)

    # Stage 2: channel-wise rescale on the flattened (N*C, HW) view.
    NC = N * C
    x2 = x_flat.reshape(NC, HW)
    s2 = s.reshape(NC, 1)
    r_tile, hw2_tile = _stage2_tiles(NC, HW, itemsize, block_target)

    out2 = pl.pallas_call(
        _scale_kernel,
        out_shape=jax.ShapeDtypeStruct((NC, HW), x.dtype),
        grid_spec=pltpu.PrefetchScalarGridSpec(
            num_scalar_prefetch=0,
            grid=(pl.cdiv(NC, r_tile), pl.cdiv(HW, hw2_tile)),
            in_specs=[
                pl.BlockSpec((r_tile, hw2_tile), lambda i, j: (i, j)),
                pl.BlockSpec((r_tile, 1), lambda i, j: (i, 0)),
            ],
            out_specs=pl.BlockSpec((r_tile, hw2_tile), lambda i, j: (i, j)),
        ),
        compiler_params=pltpu.CompilerParams(
            dimension_semantics=("parallel", "parallel"),
            vmem_limit_bytes=vmem_limit),
        cost_estimate=pl.CostEstimate(
            flops=int(N * C * HW),
            transcendentals=0,
            bytes_accessed=int(2 * N * C * HW * itemsize + N * C * itemsize)),
    )(x2, s2)

    return out2.reshape(N, C, H, W)


def se_layer_ref(x, w1, w2t):
    """Pure-JAX reference mirroring the PyTorch SELayer forward."""
    pooled = jnp.mean(x, axis=(2, 3))                 # (N, C)
    h = jnp.maximum(pooled @ w1, 0.0)                 # (N, C_r)
    s = jax.nn.sigmoid(h @ w2t.T)                     # (N, C)
    return x * s[:, :, None, None]


if __name__ == "__main__":
    # Small shapes consistent with the module (channel must be >= reduction).
    N, C, H, W = 2, 32, 16, 16
    reduction = 16
    C_r = C // reduction                              # hidden = 2

    key = jax.random.PRNGKey(0)
    kx, k1, k2, kx2 = jax.random.split(key, 4)

    x = jax.random.normal(kx, (N, C, H, W), dtype=jnp.float32)

    # Bias-free Linear weights (stored in the (C, C_r) layout described above).
    bound1 = 1.0 / (C ** 0.5)
    bound2 = 1.0 / (C_r ** 0.5)
    w1 = jax.random.uniform(k1, (C, C_r), jnp.float32, -bound1, bound1)
    w2t = jax.random.uniform(k2, (C, C_r), jnp.float32, -bound2, bound2)

    # Fused single-pass path (the default for shapes like this).
    out = jax.block_until_ready(se_layer(x, w1, w2t))
    ref = se_layer_ref(x, w1, w2t)
    assert out.shape == (N, C, H, W)
    assert jnp.allclose(out, ref, atol=2e-5, rtol=1e-4), (
        float(jnp.max(jnp.abs(out - ref))))

    # Also exercise the streaming two-stage fallback (incl. masked, non-128-
    # multiple HW tail) at a small shape so both paths stay verified.
    x2 = jax.random.normal(kx2, (N, C, 20, 20), dtype=jnp.float32)
    out2 = jax.block_until_ready(se_layer(x2, w1, w2t, force_two_stage=True))
    ref2 = se_layer_ref(x2, w1, w2t)
    assert jnp.allclose(out2, ref2, atol=2e-5, rtol=1e-4), (
        float(jnp.max(jnp.abs(out2 - ref2))))

    print("KERNEL_OK")
</pallas_src>

<mosaic_0001>
module attributes {stable_mosaic.version = 11 : i64} {
  func.func @_fused_kernel(%arg0: i32, %arg1: memref<1x32x256xf32, #tpu.memory_space<vmem>>, %arg2: memref<32x2xf32, #tpu.memory_space<vmem>>, %arg3: memref<32x2xf32, #tpu.memory_space<vmem>>, %arg4: memref<1x32x256xf32, #tpu.memory_space<vmem>>) attributes {dimension_semantics = [#tpu.dimension_semantics<parallel>], iteration_bounds = array<i64: 2>, scalar_prefetch = 0 : i64, scratch_operands = 0 : i64, tpu.core_type = #tpu.core_type<tc>, window_params = [{transform_indices = @transform_0, window_bounds = array<i64: 1, 32, 256>}, {pipeline_mode = #tpu.pipeline_mode<synchronous>, transform_indices = @transform_1, window_bounds = array<i64: 32, 2>}, {pipeline_mode = #tpu.pipeline_mode<synchronous>, transform_indices = @transform_2, window_bounds = array<i64: 32, 2>}, {transform_indices = @transform_3, window_bounds = array<i64: 1, 32, 256>}]} {
    %c0 = arith.constant 0 : index
    %c0_0 = arith.constant 0 : index
    %c0_1 = arith.constant 0 : index
    %0 = vector.load %arg1[%c0, %c0_0, %c0_1] : memref<1x32x256xf32, #tpu.memory_space<vmem>>, vector<1x32x256xf32>
    %1 = vector.shape_cast %0 : vector<1x32x256xf32> to vector<32x256xf32>
    %cst = arith.constant dense<0.000000e+00> : vector<32xf32>
    %2 = vector.multi_reduction <add>, %1, %cst [1] : vector<32x256xf32> to vector<32xf32>
    %3 = vector.shape_cast %2 : vector<32xf32> to vector<32x1xf32>
    %cst_2 = arith.constant 3.906250e-03 : f32
    %4 = vector.broadcast %cst_2 : f32 to vector<32x1xf32>
    %5 = arith.mulf %3, %4 : vector<32x1xf32>
    %c0_3 = arith.constant 0 : index
    %c0_4 = arith.constant 0 : index
    %6 = vector.load %arg2[%c0_3, %c0_4] : memref<32x2xf32, #tpu.memory_space<vmem>>, vector<32x2xf32>
    %c0_5 = arith.constant 0 : index
    %c0_6 = arith.constant 0 : index
    %7 = vector.load %arg3[%c0_5, %c0_6] : memref<32x2xf32, #tpu.memory_space<vmem>>, vector<32x2xf32>
    %8 = vector.broadcast %5 : vector<32x1xf32> to vector<32x2xf32>
    %9 = arith.mulf %8, %6 : vector<32x2xf32>
    %cst_7 = arith.constant dense<0.000000e+00> : vector<2xf32>
    %10 = vector.multi_reduction <add>, %9, %cst_7 [0] : vector<32x2xf32> to vector<2xf32>
    %11 = vector.shape_cast %10 : vector<2xf32> to vector<1x2xf32>
    %cst_8 = arith.constant 0.000000e+00 : f32
    %12 = vector.broadcast %cst_8 : f32 to vector<1x2xf32>
    %13 = arith.maximumf %11, %12 : vector<1x2xf32>
    %14 = vector.broadcast %13 : vector<1x2xf32> to vector<32x2xf32>
    %15 = arith.mulf %7, %14 : vector<32x2xf32>
    %cst_9 = arith.constant dense<0.000000e+00> : vector<32xf32>
    %16 = vector.multi_reduction <add>, %15, %cst_9 [1] : vector<32x2xf32> to vector<32xf32>
    %17 = vector.shape_cast %16 : vector<32xf32> to vector<32x1xf32>
    %18 = arith.negf %17 : vector<32x1xf32>
    %19 = math.exp %18 : vector<32x1xf32>
    %cst_10 = arith.constant 1.000000e+00 : f32
    %20 = vector.broadcast %cst_10 : f32 to vector<32x1xf32>
    %21 = arith.addf %20, %19 : vector<32x1xf32>
    %22 = arith.divf %20, %21 : vector<32x1xf32>
    %23 = vector.broadcast %22 : vector<32x1xf32> to vector<32x256xf32>
    %24 = arith.mulf %1, %23 : vector<32x256xf32>
    %c0_11 = arith.constant 0 : index
    %c0_12 = arith.constant 0 : index
    %c0_13 = arith.constant 0 : index
    %25 = vector.load %arg4[%c0_11, %c0_12, %c0_13] : memref<1x32x256xf32, #tpu.memory_space<vmem>>, vector<1x32x256xf32>
    %26 = vector.shape_cast %25 : vector<1x32x256xf32> to vector<32x256xf32>
    %27 = vector.shape_cast %24 : vector<32x256xf32> to vector<1x32x256xf32>
    tpu.vector_store %arg4[%c0_11, %c0_12, %c0_13], %27 {strides = array<i32>} : memref<1x32x256xf32, #tpu.memory_space<vmem>>, vector<1x32x256xf32>,
    return
  }
  func.func @transform_0(%arg0: i32) -> (i32, i32, i32) {
    %c0_i32 = arith.constant 0 : i32
    %c0_i32_0 = arith.constant 0 : i32
    %c0_i32_1 = arith.constant 0 : i32
    return %arg0, %c0_i32, %c0_i32_0 : i32, i32, i32
  }
  func.func @transform_1(%arg0: i32) -> (i32, i32) {
    %c0_i32 = arith.constant 0 : i32
    %c0_i32_0 = arith.constant 0 : i32
    %c0_i32_1 = arith.constant 0 : i32
    return %c0_i32, %c0_i32_0 : i32, i32
  }
  func.func @transform_2(%arg0: i32) -> (i32, i32) {
    %c0_i32 = arith.constant 0 : i32
    %c0_i32_0 = arith.constant 0 : i32
    %c0_i32_1 = arith.constant 0 : i32
    return %c0_i32, %c0_i32_0 : i32, i32
  }
  func.func @transform_3(%arg0: i32) -> (i32, i32, i32) {
    %c0_i32 = arith.constant 0 : i32
    %c0_i32_0 = arith.constant 0 : i32
    %c0_i32_1 = arith.constant 0 : i32
    return %arg0, %c0_i32, %c0_i32_0 : i32, i32, i32
  }
}

</mosaic_0001>

<bundles_post_ra>
// kernel: tpu_custom_call.1
= control target key start
LH: loop header
LB: loop body
LE: loop exit
PB: predicated region body
PF: predicated region fallthrough
CT: control target
= control target key end

     0   :  { %8 = vsyncpa [#allocation3], 0  ;;  %s811_s0 = inlined_call_operand.hbm [shape: f32[2,32,256], index: 0, kind: input, shape index: {}]   ;;  %s812_s1 = inlined_call_operand.vmem [shape: f32[32,2], index: 1, kind: input, shape index: {}]   ;;  %s813_s2 = inlined_call_operand.vmem [shape: f32[32,2], index: 2, kind: input, shape index: {}]   ;;  %s814_s3 = inlined_call_operand.hbm [shape: f32[2,32,256], index: 3, kind: output, shape index: {}]  }
   0x1   :  { %10 = vsyncpa [#allocation3 + $0x1], 0 }
   0x2   :  { %11 = vsyncpa [#allocation4], 0 }
   0x3   :  { %13 = vsyncpa [#allocation4 + $0x1], 0  ;;  %s589_s12 = smov 0   ;;  %s591_s13 = smov 0  }
   0x4   :  { %s593_s14 = smov 0   ;;  %s595_s15 = smov 0  }
   0x5 LB: > { %s610_s16 = sadd.s32 4294967295, %s561_s15   ;;  %s383_s17 = sadd.s32 4294967294, %s561_s15   ;;  %s561_s15 = sphi %s595_s15, %s829_s15   ;;  %s557_s14 = sphi %s593_s14, %s828_s14   ;;  %s553_s13 = sphi %s591_s13, %s827_s13   ;;  %s549_s12 = sphi %s589_s12, %s826_s12  }
   0x6   : > { %s614_s18 = sadd.s32 1, %s561_s15   ;;  %s26_s19 = sadd.s32 1, %s557_s14 }
   0x7   : > { %s23_s20 = ssub.s32 %s561_s15, %s614_s18  ;;  %p33_p0 = scmp.ne.s32.totalorder %s557_s14, %s553_s13 }
   0x8   : > { %p24_p1 = scmp.eq.s32.totalorder %s23_s20, 0  ;;  %p34_p2 = scmp.eq.s32.totalorder %s561_s15, 0 }
   0x9   : > { %p39_p3 = scmp.ne.s32.totalorder %s553_s13, %s549_s12  ;;  %p40_p4 = scmp.eq.s32.totalorder %s610_s16, 0 }
   0xa   : > { %s626_s21 = scalar_select %p24_p1, %s557_s14, %s26_s19  }
   0xb   : > { %p628_p5 = por %p34_p2, %p33_p0  ;;  %p632_p6 = por %p40_p4, %p39_p3 }
   0xc   : > { %p105_p7 = scmp.eq.s32.totalorder %s610_s16, 1  ;;  %p111_p8 = scmp.eq.s32.totalorder %s383_s17, 1 }
   0xd   : > { %s818_s23 = scalar_select %p632_p6, 1, 0 }
   0xe   : > { %p415_p10 = scmp.lt.s32.totalorder %s561_s15, 2  ;;  %p639_p11 = por %p105_p7, %p33_p0 }
   0xf   : > { %p643_p12 = por %p111_p8, %p39_p3  ;;  %s137_s26 = sand.u32 1, %s557_s14  }
  0x10   : > { %s819_s24 = scalar_select %p639_p11, 1, 0 }
  0x11   : > { %s820_s25 = scalar_select %p643_p12, 1, 0 }
  0x12   : > { %s401_s27 = sshll.u32 %s561_s15, 10  ;;  %s386_s28 = sshll.u32 %s137_s26, 6 }
  0x13   : > { %s652_s4 = scalar_lea.hbm %s811_s0, %s401_s27  ;;  %s141_s5 = scalar_lea.vmem [#allocation2], %s386_s28 }
  0x14   : > { %s148_s6 = sshll.u32 %s141_s5, 4  ;;  %p656_p13 = pnand %p415_p10, %p628_p5  ;;  %s660_s6 = int_to_ptr.vmem [resolvable:$true] %s148_s6 }
  0x15   : > { %s662_s8 = scalar_lea.sflag [#allocation3], %s137_s26  ;;  %s469_s9 = scalar_lea.hbm %s652_s4, 1024 }
  0x16   : > { %p470_p0 = scmp.ne.s32.totalorder %s652_s4, %s469_s9  ;;  %p471_p1 = pneg %p656_p13 }
  0x17   : > { %s474_s17 = scalar_lea.hbm %s811_s0, 2048  ;;  %p475_p4 = scmp.lt.s32.totalorder %s652_s4, %s811_s0 }
  0x18   : > { %p472_p2 = pnand %p471_p1, %p470_p0  ;;  %p476_p5 = scmp.lt.s32.totalorder %s474_s17, %s469_s9 }
  0x1a   : > { %p473_p3 = pneg %p472_p2  ;;  %p477_p7 = por %p476_p5, %p475_p4 }
  0x1c   : > { %p478_p8 = pnand %p477_p7, %p473_p3 }
  0x1e   : > { %481 = shalt.err (!%p478_p8)
}
  0x1f   : > { %s482_s22 = scalar_lea.vmem %s660_s6, 1024  ;;  %s563_s26 = smov [#allocation2]  }
  0x20   : > { %p483_p10 = scmp.ne.s32.totalorder %s660_s6, %s482_s22  ;;  %s487_s27 = sshll.u32 %s563_s26, 4  ;;  %s488_s27 = int_to_ptr.vmem [resolvable:$false] %s487_s27 }
  0x21   : > { %s489_s28 = scalar_lea.vmem %s488_s27, 2048  ;;  %p490_p2 = scmp.lt.s32.totalorder %s660_s6, %s488_s27 }
  0x22   : > { %p485_p9 = pnand %p483_p10, %p471_p1  ;;  %p491_p12 = scmp.lt.s32.totalorder %s489_s28, %s482_s22 }
  0x24   : > { %p486_p0 = pneg %p485_p9  ;;  %p492_p11 = por %p491_p12, %p490_p2 }
  0x26   : > { %p493_p6 = pnand %p492_p11, %p486_p0 }
  0x28   : > { %496 = shalt.err (!%p493_p6)
}
  0x29   : > { %s564_s29 = smov 256   ;;  %s565_s30 = smov 16  }
  0x2a   : > { %410 = dma.hbm_to_vmem [thread:$0]  (!%p656_p13), %s652_s4, 1024, %s660_s6, %s662_s8, %s564_s29, %s564_s29, %s565_s30  }
  0x2b   : > { %p389_p9 = scmp.ge.s32.totalorder %s561_s15, 1  ;;  %p156_p1 = scmp.lt.s32.totalorder %s561_s15, 3 }
  0x2d   : > { %p157_p3 = pnand %p389_p9, %p156_p1 }
  0x2e   : > { %s686_s5 = sand.u32 (!%p157_p3), 1, %s553_s13   ;;  %p822_p6 = scmp.ne.s32.totalorder (!%p157_p3), %s818_s23, 0 }
  0x2f   : > { %160 = sbr.rel (%p157_p3) target bundleno = 417 (0x1a1), region = 32  ;;  %s390_s9 = sshll.u32 (!%p157_p3), %s686_s5, 6 }
  0x30   : > { %s163_s10 = scalar_lea.sflag (!%p157_p3), [#allocation3], %s686_s5  ;;  %s166_s11 = scalar_lea.vmem (!%p157_p3), [#allocation2], %s390_s9 }
  0x34   : > { %540 = dma.done.wait (%p822_p6), %s163_s10, 1024  }
  0x35   : > { %542 = vsyncadd (%p822_p6), %s163_s10, 4294966272  ;;  %v696_v0 = vld [vmem:[%s166_s11] sm:$0xff]  ;;  %v698_v1 = vld [vmem:[%s166_s11 + $0x8] sm:$0xff]  ;;  %vm225_vm0 = vcmask 15360   ;;  %s402_s23 = sshll.u32 %s610_s16, 10  ;;  %s188_s4 = scalar_lea.vmem [#allocation5], %s390_s9 }
  0x36   : > { %v700_v2 = vld [vmem:[%s166_s11 + $0x20] sm:$0xff]  ;;  %v197_v3 = vadd.f32 %v698_v1, %v696_v0  ;;  %v704_v4 = vld [vmem:[%s166_s11 + $0x28] sm:$0xff]  ;;  %v706_v5 = vld [vmem:[%s166_s11 + $0x10] sm:$0xff]  ;;  %s310_s6 = sshll.u32 %s188_s4, 4  ;;  %s764_s17 = scalar_lea.hbm %s814_s3, %s402_s23  ;;  %s766_s6 = int_to_ptr.vmem [resolvable:$true] %s310_s6 }
  0x37   : > { %v708_v6 = vld [vmem:[%s166_s11 + $0x18] sm:$0xff]  ;;  %v203_v7 = vadd.f32 %v704_v4, %v700_v2  ;;  %v712_v8 = vld [vmem:[%s166_s11 + $0x30] sm:$0xff]  ;;  %v213_v15 = vld [vmem:[%s812_s1] sm:$0xff]  ;;  %s297_s16 = scalar_lea.sflag [#allocation4], %s686_s5  ;;  %s497_s9 = scalar_lea.vmem %s766_s6, 1024 }
  0x38   : > { %v714_v9 = vld [vmem:[%s166_s11 + $0x38] sm:$0xff]  ;;  %198 = vadd.xlane.f32.xlu0 %v197_v3  ;;  %v200_v10 = vadd.f32 %v708_v6, %v706_v5  ;;  %v215_v17 = vld [vmem:[%s812_s1 + $0x10] sm:$0xff]  ;;  %v214_v18 = vld [vmem:[%s812_s1 + $0x8] sm:$0xff]  ;;  %p498_p11 = scmp.ne.s32.totalorder %s766_s6, %s497_s9  ;;  %p823_p12 = scmp.ne.s32.totalorder %s819_s24, 0 }
  0x39   : > { %204 = vadd.xlane.f32.xlu1 %v203_v7  ;;  %v206_v11 = vadd.f32 %v714_v9, %v712_v8  ;;  %v216_v22 = vld [vmem:[%s812_s1 + $0x18] sm:$0xff]  ;;  %v218_v41 = vld [vmem:[%s813_s2 + $0x8] sm:$0xff]  ;;  %v217_v42 = vld [vmem:[%s813_s2] sm:$0xff]  ;;  %s566_s19 = smov [#allocation5]  }
  0x3a   : > { %v220_v44 = vld [vmem:[%s813_s2 + $0x18] sm:$0xff]  ;;  %v219_v45 = vld [vmem:[%s813_s2 + $0x10] sm:$0xff]  ;;  %p499_p13 = pnand %p498_p11, %p823_p12  ;;  %s501_s20 = sshll.u32 %s566_s19, 4  ;;  %s502_s20 = int_to_ptr.vmem [resolvable:$false] %s501_s20 }
  0x3b   : > { %s503_s22 = scalar_lea.vmem %s502_s20, 2048  ;;  %p504_p5 = scmp.lt.s32.totalorder %s766_s6, %s502_s20 }
  0x3c   : > { %201 = vadd.xlane.f32.xlu0 %v200_v10  ;;  %p500_p4 = pneg %p499_p13  ;;  %p505_p7 = scmp.lt.s32.totalorder %s503_s22, %s497_s9 }
  0x3d   : > { %207 = vadd.xlane.f32.xlu1 %v206_v11 }
  0x3e   : > { %p506_p8 = por %p505_p7, %p504_p5 }
  0x40   : > { %p507_p10 = pnand %p506_p8, %p500_p4 }
  0xc1   : > { %v199_v12 = vpop.xlane.xlu0 %198 }
  0xc2   : > { %v209_v13 = vmul.f32 0.00390625, %v199_v12  ;;  %v205_v14 = vpop.xlane.xlu1 %204 }
  0xc3   : > { %v211_v16 = vmul.f32 0.00390625, %v205_v14 }
  0xc4   : > { %v221_v20 = vmul.f32 %v213_v15, %v209_v13 }
  0xc5   : > { %v202_v19 = vpop.xlane.xlu0 %201  ;;  %v223_v25 = vmul.f32 %v215_v17, %v211_v16 }
  0xc6   : > { %v210_v21 = vmul.f32 0.00390625, %v202_v19  ;;  %v208_v23 = vpop.xlane.xlu1 %207  ;;  %v226_v28 = vsel %vm225_vm0, %v221_v20, 0.0 }
  0xc7   : > { %v212_v24 = vmul.f32 0.00390625, %v208_v23  ;;  %v229_v31 = vsel %vm225_vm0, %v223_v25, 0.0 }
  0xc8   : > { %v222_v26 = vmul.f32 %v214_v18, %v210_v21 }
  0xc9   : > { %v224_v27 = vmul.f32 %v216_v22, %v212_v24 }
  0xca   : > { %v227_v29 = vsel %vm225_vm0, %v222_v26, 0.0 }
  0xcb   : > { %v228_v30 = vadd.f32 %v227_v29, %v226_v28  ;;  %v231_v32 = vsel %vm225_vm0, %v224_v27, 0.0 }
  0xcd   : > { %v230_v33 = vadd.f32 %v229_v31, %v228_v30 }
  0xcf   : > { %v232_v34 = vadd.f32 %v231_v32, %v230_v33 }
  0xd1   : > { %v233_v35 = vrot.slane %v232_v34, 4 }
  0xd3   : > { %v234_v36 = vadd.f32 %v233_v35, %v232_v34 }
  0xd5   : > { %v235_v37 = vrot.slane %v234_v36, 2 }
  0xd7   : > { %v236_v38 = vadd.f32 %v235_v37, %v234_v36 }
  0xd9   : > { %v237_v39 = vrot.slane %v236_v38, 1 }
  0xdb   : > { %v238_v40 = vadd.f32 %v237_v39, %v236_v38 }
  0xdd   : > { %v239_v43 = vmax.f32 %v238_v40, 0.0 }
  0xdf   : > { %v241_v46 = vmul.f32 %v239_v43, %v218_v41  ;;  %v240_v47 = vmul.f32 %v239_v43, %v217_v42  ;;  %v243_v50 = vmul.f32 %v239_v43, %v220_v44  ;;  %v242_v51 = vmul.f32 %v239_v43, %v219_v45 }
  0xe1   : > { %v247_v48 = vsel %vm225_vm0, %v241_v46, 0.0  ;;  %v244_v49 = vsel %vm225_vm0, %v240_v47, 0.0  ;;  %v253_v52 = vsel %vm225_vm0, %v243_v50, 0.0  ;;  %v250_v53 = vsel %vm225_vm0, %v242_v51, 0.0 }
  0xe2   : > { %248 = vadd.xlane.f32.xlu1 %v247_v48  ;;  %245 = vadd.xlane.f32.xlu0 %v244_v49 }
  0xe6   : > { %254 = vadd.xlane.f32.xlu1 %v253_v52  ;;  %251 = vadd.xlane.f32.xlu0 %v250_v53 }
 0x16b   : > { %v249_v54 = vpop.xlane.xlu1 %248  ;;  %v246_v55 = vpop.xlane.xlu0 %245 }
 0x16c   : > { %v393_v56 = vmul.f32 -1.442695, %v249_v54  ;;  %v392_v57 = vmul.f32 -1.442695, %v246_v55 }
 0x16e   : > { %453 = vpow2.f32 %v393_v56 }
 0x16f   : > { %455 = vpow2.f32 %v392_v57  ;;  %v255_v58 = vpop.xlane.xlu1 %254  ;;  %v252_v59 = vpop.xlane.xlu0 %251 }
 0x170   : > { %v395_v60 = vmul.f32 -1.442695, %v255_v58  ;;  %v394_v61 = vmul.f32 -1.442695, %v252_v59 }
 0x172   : > { %457 = vpow2.f32 %v395_v60 }
 0x173   : > { %459 = vpow2.f32 %v394_v61 }
 0x17b   : > { %v454_v62 = vpop.eup %453 }
 0x17c   : > { %v456_v63 = vpop.eup %455  ;;  %v269_v3 = vadd.f32 1.0, %v454_v62 }
 0x17d   : > { %v268_v7 = vadd.f32 1.0, %v456_v63 }
 0x17e   : > { %461 = vrcp.f32 %v269_v3 }
 0x17f   : > { %v458_v10 = vpop.eup %457  ;;  %463 = vrcp.f32 %v268_v7 }
 0x180   : > { %v460_v11 = vpop.eup %459  ;;  %v271_v12 = vadd.f32 1.0, %v458_v10 }
 0x181   : > { %v270_v13 = vadd.f32 1.0, %v460_v11 }
 0x182   : > { %465 = vrcp.f32 %v271_v12 }
 0x183   : > { %467 = vrcp.f32 %v270_v13 }
 0x18b   : > { %v462_v14 = vpop.eup %461 }
 0x18c   : > { %v464_v15 = vpop.eup %463  ;;  %v282_v16 = vmul.f32 %v462_v14, %v706_v5  ;;  %v283_v17 = vmul.f32 %v462_v14, %v708_v6 }
 0x18d   : > { %v280_v18 = vmul.f32 %v464_v15, %v696_v0  ;;  %v281_v19 = vmul.f32 %v464_v15, %v698_v1 }
 0x18e   : > { %290 = vst [vmem:[%s188_s4 + $0x10] sm:$0xff] %v282_v16  ;;  %291 = vst [vmem:[%s188_s4 + $0x18] sm:$0xff] %v283_v17 }
 0x18f   : > { %v466_v20 = vpop.eup %465  ;;  %288 = vst [vmem:[%s188_s4] sm:$0xff] %v280_v18  ;;  %289 = vst [vmem:[%s188_s4 + $0x8] sm:$0xff] %v281_v19 }
 0x190   : > { %v468_v21 = vpop.eup %467  ;;  %v286_v5 = vmul.f32 %v466_v20, %v712_v8  ;;  %v287_v6 = vmul.f32 %v466_v20, %v714_v9 }
 0x191   : > { %v284_v0 = vmul.f32 %v468_v21, %v700_v2  ;;  %v285_v1 = vmul.f32 %v468_v21, %v704_v4 }
 0x192   : > { %294 = vst [vmem:[%s188_s4 + $0x30] sm:$0xff] %v286_v5  ;;  %295 = vst [vmem:[%s188_s4 + $0x38] sm:$0xff] %v287_v6 }
 0x193   : > { %292 = vst [vmem:[%s188_s4 + $0x20] sm:$0xff] %v284_v0  ;;  %293 = vst [vmem:[%s188_s4 + $0x28] sm:$0xff] %v285_v1 }
 0x194   : > { %510 = shalt.err (!%p507_p10)
}
 0x195   : > { %s511_s26 = scalar_lea.hbm %s764_s17, 1024  ;;  %s515_s29 = scalar_lea.hbm %s814_s3, 2048 }
 0x196   : > { %p512_p0 = scmp.ne.s32.totalorder %s764_s17, %s511_s26  ;;  %p516_p1 = scmp.lt.s32.totalorder %s764_s17, %s814_s3 }
 0x197   : > { %p517_p3 = scmp.lt.s32.totalorder %s515_s29, %s511_s26 }
 0x198   : > { %p513_p2 = pnand %p512_p0, %p823_p12 }
 0x199   : > { %p518_p6 = por %p517_p3, %p516_p1 }
 0x19a   : > { %p514_p9 = pneg %p513_p2 }
 0x19c   : > { %p519_p11 = pnand %p518_p6, %p514_p9 }
 0x19e   : > { %522 = shalt.err (!%p519_p11)
}
 0x19f   : > { %s567_s11 = smov 256   ;;  %s568_s23 = smov 16  }
 0x1a0   : > { %405 = dma.vmem_to_hbm [thread:$0]  (%p823_p12), %s766_s6, 1024, %s764_s17, %s297_s16, %s567_s11, %s567_s11, %s568_s23  }
 0x1a1 PF: > { %s325_s4 = sand.u32 1, %s549_s12   ;;  %p824_p13 = scmp.ne.s32.totalorder %s820_s25, 0 }
 0x1a2   : > { %p825_p4 = scmp.ge.s32.totalorder %s561_s15, 2  ;;  %s326_s7 = scalar_lea.sflag [#allocation4], %s325_s4 }
 0x1a4   : > { %p412_p5 = pnand %p825_p4, %p824_p13 }
 0x1a6   : > { %p413_p7 = pneg %p412_p5 }
 0x1a8   : > { %544 = dma.done.wait (%p413_p7), %s326_s7, 1024  }
 0x1a9   : > { %546 = vsyncadd (%p413_p7), %s326_s7, 4294966272  ;;  %p16_p8 = scmp.ge.s32.totalorder %s614_s18, 4   ;;  %s826_s12 = smov %s553_s13 }
 0x1aa   : > { %s827_s13 = smov %s557_s14  ;;  %s828_s14 = smov %s626_s21 }
 0x1ab   : > { %s829_s15 = smov %s614_s18  ;;  %18 = sbr.rel (!%p16_p8) target bundleno = 5 (0x5), region = 77 }
 0x1b0   :  { %331 = vsyncpa [#allocation3], 1 }
 0x1b1   :  { %333 = vsyncpa [#allocation3 + $0x1], 1 }
 0x1b2   :  { %334 = vsyncpa [#allocation4], 1 }
 0x1b3   :  { %336 = vsyncpa [#allocation4 + $0x1], 1 }

</bundles_post_ra>
